<compile_context>
chip_gen: v7x
topology: tpu7x:2x2x1
jax: 0.10.0
libtpu: 0.0.40
codegen_flags: <defaults>
</compile_context>

<pallas_src>
import functools

import jax
import jax.numpy as jnp
from jax.experimental import pallas as pl
from jax.experimental.pallas import tpu as pltpu


# ---------------------------------------------------------------------------
# Helpers
# ---------------------------------------------------------------------------
def _fill_value(dtype):
    """Identity element of `max` for this dtype (Python scalar)."""
    dtype = jnp.dtype(dtype)
    if jnp.issubdtype(dtype, jnp.floating):
        return -jnp.inf
    if jnp.issubdtype(dtype, jnp.integer):
        return int(jnp.iinfo(dtype).min)
    if dtype == jnp.dtype(jnp.bool_):
        return False
    raise TypeError(f"max-reduction not supported for dtype {dtype}")


def _vmem_capacity_bytes():
    """Physical VMEM of the current chip generation, or None if unknown."""
    try:
        info = pltpu.get_tpu_info()
        cap = getattr(info, "vmem_capacity_bytes", None)
        if cap:
            return int(cap)
    except Exception:
        pass
    return None


def _largest_aligned_divisor(total, upper, align):
    """Largest multiple of `align` dividing `total`, <= `upper` and >= upper//2.
    Returns None if no such divisor exists (caller keeps the aligned non-divisor)."""
    lo = max(align, upper // 2)
    d = (upper // align) * align
    while d >= lo:
        if total % d == 0:
            return d
        d -= align
    return None


def _choose_tiles(B, S, H, itemsize, budget):
    """Pick (Bb, Sb, pack): output tile sublane-dense, input tile ~= `budget`."""
    # Sublanes per vreg for this dtype: 8 (f32), 16 (bf16), 32 (int8/fp8).
    pack = 8 * max(1, 4 // itemsize)
    Bb = B if B <= pack else pack
    row_bytes = H * itemsize

    sb_raw = max(1, budget // max(1, Bb * row_bytes))
    if sb_raw >= S:
        Sb = S
        # Whole sequence fits one tile: grow the batch tile (in pack multiples) to
        # fill the budget -> proportionally fewer grid steps, same DMA contiguity.
        if B > Bb:
            rows_fit = budget // max(1, S * row_bytes)
            grown = (rows_fit // pack) * pack
            if grown > Bb:
                Bb = min(B, grown)
    else:
        Sb = max(pack, (sb_raw // pack) * pack)   # dtype-aware sublane alignment
        if Sb >= S:
            Sb = S
        else:
            d = _largest_aligned_divisor(S, Sb, pack)  # avoid masking if possible
            if d is not None:
                Sb = d
    return Bb, Sb, pack


# ---------------------------------------------------------------------------
# Kernel: running max over the sequence (token) axis
# ---------------------------------------------------------------------------
def _max_over_seq_kernel(x_ref, o_ref, *, seq_len, seq_tile, mask_seq, n_seq):
    """x_ref: (Bb, Sb, Hb) input tile.  o_ref: (Bb, Hb) output-resident accumulator.

    Grid is (batch_blocks, hidden_blocks, seq_blocks); the seq axis (last,
    'arbitrary') is the reduction axis, so o_ref holds the running max across it.
    """
    fill = _fill_value(o_ref.dtype)

    def masked_last_tile(x):
        # Only the final S tile can overhang the real sequence extent; mask those
        # positions to the max-identity. (Sb, 1) iota broadcasts over batch/lanes.
        base = (n_seq - 1) * seq_tile
        pos = jax.lax.broadcasted_iota(jnp.int32, (x.shape[1], 1), 0)
        return jnp.where(base + pos < seq_len, x, jnp.asarray(fill, x.dtype))

    if n_seq == 1:
        # Single-step fast path: no accumulator traffic at all.
        x = x_ref[...]
        if mask_seq:
            x = masked_last_tile(x)
        o_ref[...] = jnp.max(x, axis=1)
        return

    s = pl.program_id(2)

    # Seed with the identity of max once, then one unconditional update per step.
    @pl.when(s == 0)
    def _seed():
        o_ref[...] = jnp.full(o_ref.shape, fill, o_ref.dtype)

    if not mask_seq:
        o_ref[...] = jnp.maximum(o_ref[...], jnp.max(x_ref[...], axis=1))
    else:
        last = n_seq - 1

        @pl.when(s < last)
        def _full_tiles():
            o_ref[...] = jnp.maximum(o_ref[...], jnp.max(x_ref[...], axis=1))

        @pl.when(s == last)
        def _partial_tile():
            o_ref[...] = jnp.maximum(
                o_ref[...], jnp.max(masked_last_tile(x_ref[...]), axis=1))


# ---------------------------------------------------------------------------
# Wrapper (the "module")
# ---------------------------------------------------------------------------
def output_layer(x, cls_head: bool = False, *,
                 batch_tile=None, seq_tile=None, hidden_tile=None):
    """Pallas implementation of OutputLayer.forward.

    x: [B, S, H] array.  Returns [B, H] (same dtype as x):
      cls_head=False -> max over dim=1 (values only, matching torch.max(x, 1)[0])
      cls_head=True  -> x[:, 0] (Identity on the CLS token)
    """
    if cls_head:
        # torch: self.to_cls_token(x[:, 0]) with nn.Identity().  Pure strided slice:
        # XLA does this as one bandwidth-limited copy; a Pallas kernel would only add
        # per-row DMA + grid-step overhead.
        return x[:, 0]

    B, S, H = x.shape
    itemsize = jnp.dtype(x.dtype).itemsize

    # Generation-aware per-input-tile budget (Pallas double/triple-buffers it).
    vmem_cap = _vmem_capacity_bytes()
    small_vmem = vmem_cap is not None and vmem_cap < (128 << 20)   # v7x-class: 64 MiB/TC
    budget = (8 << 20) if (small_vmem or vmem_cap is None) else (12 << 20)

    Bb, Sb, pack = _choose_tiles(B, S, H, itemsize, budget)
    if batch_tile is not None:
        Bb = int(batch_tile)
    if seq_tile is not None:
        Sb = int(seq_tile)

    n_b = pl.cdiv(B, Bb)

    # Keep the parallel grid at >=2 iterations (v7x megacore: 2 TensorCores) by also
    # tiling H when the batch axis alone would give a single parallel step.
    if hidden_tile is not None:
        Hb = int(hidden_tile)
    elif n_b < 2 and H >= 512 and H % 128 == 0:
        Hb = min(H, (((H + 1) // 2 + 127) // 128) * 128)   # ~H/2, multiple of 128
    else:
        Hb = H
    n_h = pl.cdiv(H, Hb)

    n_s = pl.cdiv(S, Sb)
    mask_seq = (S % Sb) != 0

    in_tile_bytes = Bb * Sb * Hb * itemsize
    out_tile_bytes = Bb * Hb * itemsize

    # 3-deep input buffering on small-VMEM (v7x-class) parts with modest tiles: the
    # per-step fixed overhead is a larger fraction of the (much faster) DMA there.
    use_buffered = small_vmem and in_tile_bytes <= (8 << 20)
    n_in_buf = 3 if use_buffered else 2

    # Explicit scoped-VMEM request with headroom, clamped per generation.
    required = n_in_buf * in_tile_bytes + 2 * out_tile_bytes + (2 << 20)
    cap = (48 << 20) if (small_vmem or vmem_cap is None) else (96 << 20)
    vmem_limit = int(min(max(required, 24 << 20), cap))
    vmem_limit = max(vmem_limit, required)           # never below what we need
    if vmem_cap is not None:
        vmem_limit = min(vmem_limit, vmem_cap)       # never above physical VMEM

    kernel = functools.partial(
        _max_over_seq_kernel,
        seq_len=S, seq_tile=Sb, mask_seq=mask_seq, n_seq=n_s)

    in_spec_kwargs = {}
    if use_buffered:
        in_spec_kwargs["pipeline_mode"] = pl.Buffered(3)

    return pl.pallas_call(
        kernel,
        out_shape=jax.ShapeDtypeStruct((B, H), x.dtype),
        grid=(n_b, n_h, n_s),                         # reduction (S) axis last
        in_specs=[pl.BlockSpec((Bb, Sb, Hb), lambda i, j, s: (i, s, j),
                               **in_spec_kwargs)],
        # Same output block across the S axis -> VMEM-resident max accumulator.
        out_specs=pl.BlockSpec((Bb, Hb), lambda i, j, s: (i, j)),
        compiler_params=pltpu.CompilerParams(
            dimension_semantics=("parallel", "parallel", "arbitrary"),
            vmem_limit_bytes=vmem_limit,
        ),
    )(x)


# ---------------------------------------------------------------------------
# Demo / self-test
# ---------------------------------------------------------------------------
if __name__ == "__main__":
    key = jax.random.PRNGKey(0)

    # Small shapes consistent with the module: batch=2, seq=8, hidden=32.
    B, S, H = 2, 8, 32
    x = jax.random.normal(key, (B, S, H), dtype=jnp.float32)

    # cls_head=False (default / hot path): max over the token axis.
    y_max = jax.block_until_ready(output_layer(x, cls_head=False))
    assert y_max.shape == (B, H)
    assert jnp.allclose(y_max, jnp.max(x, axis=1)), "max-reduction mismatch"

    # cls_head=True: pick token 0 (Identity).
    y_cls = jax.block_until_ready(output_layer(x, cls_head=True))
    assert y_cls.shape == (B, H)
    assert jnp.allclose(y_cls, x[:, 0]), "cls-token mismatch"

    # Tiled / accumulating path: partial batch block + masked final sequence tile.
    B2, S2, H2 = 10, 20, 32
    x2 = jax.random.normal(jax.random.PRNGKey(1), (B2, S2, H2), dtype=jnp.float32)
    y2 = jax.block_until_ready(output_layer(x2, batch_tile=8, seq_tile=8))
    assert y2.shape == (B2, H2)
    assert jnp.allclose(y2, jnp.max(x2, axis=1)), "tiled max-reduction mismatch"

    # Megacore-style H-split path (parallel hidden axis -> 3-D grid with n_h=2).
    B3, S3, H3 = 2, 16, 512
    x3 = jax.random.normal(jax.random.PRNGKey(2), (B3, S3, H3), dtype=jnp.float32)
    y3 = jax.block_until_ready(output_layer(x3))
    assert y3.shape == (B3, H3)
    assert jnp.allclose(y3, jnp.max(x3, axis=1)), "H-split max-reduction mismatch"

    # bf16 path: dtype-aware (16-row) sequence tiles with a masked last tile.
    B4, S4, H4 = 4, 40, 256
    x4 = jax.random.normal(jax.random.PRNGKey(3), (B4, S4, H4), dtype=jnp.bfloat16)
    y4 = jax.block_until_ready(output_layer(x4, seq_tile=16))
    assert y4.shape == (B4, H4)
    assert jnp.allclose(y4, jnp.max(x4, axis=1)), "bf16 masked max mismatch"

    print("KERNEL_OK")
</pallas_src>

<mosaic_0001>
module attributes {stable_mosaic.version = 11 : i64} {
  func.func @_max_over_seq_kernel(%arg0: i32, %arg1: i32, %arg2: i32, %arg3: memref<2x8x32xf32, #tpu.memory_space<vmem>>, %arg4: memref<2x32xf32, #tpu.memory_space<vmem>>) attributes {dimension_semantics = [#tpu.dimension_semantics<parallel>, #tpu.dimension_semantics<parallel>, #tpu.dimension_semantics<arbitrary>], iteration_bounds = array<i64: 1, 1, 1>, scalar_prefetch = 0 : i64, scratch_operands = 0 : i64, tpu.core_type = #tpu.core_type<tc>, window_params = [{transform_indices = @transform_0, window_bounds = array<i64: 2, 8, 32>}, {transform_indices = @transform_1, window_bounds = array<i64: 2, 32>}]} {
    %c0 = arith.constant 0 : index
    %c0_0 = arith.constant 0 : index
    %c0_1 = arith.constant 0 : index
    %0 = vector.load %arg3[%c0, %c0_0, %c0_1] : memref<2x8x32xf32, #tpu.memory_space<vmem>>, vector<2x8x32xf32>
    %cst = arith.constant dense<0xFF800000> : vector<2x32xf32>
    %1 = vector.multi_reduction <maximumf>, %0, %cst [1] : vector<2x8x32xf32> to vector<2x32xf32>
    %c0_2 = arith.constant 0 : index
    %c0_3 = arith.constant 0 : index
    %2 = vector.load %arg4[%c0_2, %c0_3] : memref<2x32xf32, #tpu.memory_space<vmem>>, vector<2x32xf32>
    tpu.vector_store %arg4[%c0_2, %c0_3], %1 {strides = array<i32>} : memref<2x32xf32, #tpu.memory_space<vmem>>, vector<2x32xf32>,
    return
  }
  func.func @transform_0(%arg0: i32, %arg1: i32, %arg2: i32) -> (i32, i32, i32) {
    %c0_i32 = arith.constant 0 : i32
    return %arg0, %arg2, %arg1 : i32, i32, i32
  }
  func.func @transform_1(%arg0: i32, %arg1: i32, %arg2: i32) -> (i32, i32) {
    %c0_i32 = arith.constant 0 : i32
    return %arg0, %arg1 : i32, i32
  }
}

</mosaic_0001>

<bundles_post_ra>
// kernel: tpu_custom_call.1
= control target key start
LH: loop header
LB: loop body
LE: loop exit
PB: predicated region body
PF: predicated region fallthrough
CT: control target
= control target key end

     0   :  { %6 = vsyncpa [#allocation3], 0  ;;  %s152_s0 = inlined_call_operand.hbm [shape: f32[2,8,32], index: 0, kind: input, shape index: {}]   ;;  %s153_s1 = inlined_call_operand.hbm [shape: f32[2,32], index: 1, kind: output, shape index: {}]  }
   0x1   :  { %7 = vsyncpa [#allocation4], 0  ;;  %s114_s6 = smov [#allocation2]   ;;  %s66_s10 = scalar_lea.hbm %s152_s0, 256 }
   0x2   :  { %s13_s7 = sshll.u32 %s114_s6, 4  ;;  %p67_p0 = scmp.ne.s32.totalorder %s152_s0, %s66_s10  ;;  %s14_s7 = int_to_ptr.vmem [resolvable:$true] %s13_s7 }
   0x3   :  { %p70_p1 = scmp.lt.u32.totalorder %s66_s10, %s152_s0 }
   0x5   :  { %p72_p2 = pnand %p70_p1, %p67_p0 }
   0x7   :  { %75 = shalt.err (!%p72_p2)
}
   0x8   :  { %s76_s15 = scalar_lea.vmem %s14_s7, 256  ;;  %p81_p4 = scmp.lt.s32.totalorder %s14_s7, %s14_s7 }
   0x9   :  { %p77_p3 = scmp.ne.s32.totalorder %s14_s7, %s76_s15  ;;  %p82_p5 = scmp.lt.s32.totalorder %s76_s15, %s76_s15 }
   0xb   :  { %p83_p6 = por %p82_p5, %p81_p4 }
   0xd   :  { %p84_p7 = pnand %p83_p6, %p77_p3 }
   0xf   :  { %87 = shalt.err (!%p84_p7)
}
  0x10   :  { %s115_s16 = smov 128   ;;  %s116_s17 = smov 8  }
  0x11   :  { %19 = dma.hbm_to_vmem [thread:$0]  %s152_s0, 256, %s14_s7, [#allocation3], %s115_s16, %s115_s16, %s116_s17  }
  0x12   :  { %110 = dma.done.wait [#allocation3], 256  }
  0x13   :  { %111 = vsyncadd [#allocation3], 4294967040  ;;  %vm25_vm0 = vcmask 261120   ;;  %v23_v0 = vld [vmem:[#allocation2] sm:$0xff]  ;;  %v24_v1 = vld [vmem:[#allocation2 + $0x8] sm:$0xff]  ;;  %s117_s20 = smov [#allocation5]  }
  0x14   :  { %v26_v2 = vsel %vm25_vm0, %v23_v0, -inf  ;;  %v33_v3 = vsel %vm25_vm0, %v24_v1, -inf  ;;  %s53_s21 = sshll.u32 %s117_s20, 4  ;;  %vm42_vm1 = vcmask 1041409   ;;  %vm45_vm2 = vcmask 254976   ;;  %s54_s21 = int_to_ptr.vmem [resolvable:$true] %s53_s21 }
  0x15   :  { %v27_v4 = vrot.slane %v26_v2, 4  ;;  %v34_v5 = vrot.slane %v33_v3, 4  ;;  %s88_s0 = scalar_lea.vmem %s54_s21, 32  ;;  %p93_p9 = scmp.lt.s32.totalorder %s54_s21, %s54_s21 }
  0x16   :  { %p89_p8 = scmp.ne.s32.totalorder %s54_s21, %s88_s0  ;;  %p94_p10 = scmp.lt.s32.totalorder %s88_s0, %s88_s0 }
  0x17   :  { %v28_v6 = vmax.f32 %v26_v2, %v27_v4  ;;  %v35_v7 = vmax.f32 %v33_v3, %v34_v5 }
  0x18   :  { %p95_p11 = por %p94_p10, %p93_p9 }
  0x19   :  { %v29_v8 = vrot.slane %v28_v6, 2  ;;  %v36_v9 = vrot.slane %v35_v7, 2 }
  0x1a   :  { %p96_p12 = pnand %p95_p11, %p89_p8 }
  0x1b   :  { %v30_v10 = vmax.f32 %v28_v6, %v29_v8  ;;  %v37_v11 = vmax.f32 %v35_v7, %v36_v9 }
  0x1d   :  { %v31_v12 = vrot.slane %v30_v10, 1  ;;  %v38_v13 = vrot.slane %v37_v11, 1 }
  0x1f   :  { %v32_v14 = vmax.f32 %v30_v10, %v31_v12  ;;  %v39_v15 = vmax.f32 %v37_v11, %v38_v13 }
  0x21   :  { %v43_v16 = vsel %vm42_vm1, %v39_v15, %v32_v14 }
  0x22   :  { %46 = vst.msk [vmem:[#allocation5] sm:$0x3] %vm45_vm2, %v43_v16 }
  0x23   :  { %99 = shalt.err (!%p96_p12)
}
  0x24   :  { %s100_s24 = scalar_lea.hbm %s153_s1, 32 }
  0x25   :  { %p101_p13 = scmp.ne.s32.totalorder %s153_s1, %s100_s24  ;;  %p104_p0 = scmp.lt.u32.totalorder %s100_s24, %s153_s1 }
  0x27   :  { %p106_p1 = pnand %p104_p0, %p101_p13 }
  0x29   :  { %109 = shalt.err (!%p106_p1)
}
  0x2a   :  { %56 = dma.vmem_to_hbm [thread:$0]  %s54_s21, 32, %s153_s1, [#allocation4]  }
  0x2b   :  { %112 = dma.done.wait [#allocation4], 32  }
  0x2c   :  { %113 = vsyncadd [#allocation4], 4294967264 }
  0x2d   :  { %60 = vsyncpa [#allocation3], 1 }
  0x2e   :  { %61 = vsyncpa [#allocation4], 1 }

</bundles_post_ra>
